<compile_context>
chip_gen: v7x
topology: tpu7x:2x2x1
jax: 0.10.0
libtpu: 0.0.40
codegen_flags: <defaults>
</compile_context>

<pallas_src>
import functools
import math

import jax
import jax.numpy as jnp
from jax.experimental import pallas as pl
from jax.experimental.pallas import tpu as pltpu


def _row_sum_kernel(x_ref, o_ref, *, tile_n, tile_v, n_v_tiles, v_rem, use_mxu):
    """Accumulate per-row sums of x over the V (reduction) grid axis.

    Output block is (tile_n, 128) f32, VMEM-resident across the V axis (accumulator
    pattern).  MXU path replicates the row sum across the 128 lanes; f32 path
    broadcast-adds the (tile_n, 1) sum.  Only the tail V tile is masked.
    """
    j = pl.program_id(1)

    @pl.when(j == 0)
    def _():
        o_ref[...] = jnp.zeros_like(o_ref)

    def accumulate(x):
        if use_mxu:
            # Row-sum on the MXU: (tile_n, tile_v) @ (tile_v, 128) ones, f32 accumulate.
            ones = jnp.ones((tile_v, 128), dtype=x.dtype)
            o_ref[...] += jnp.dot(x, ones, preferred_element_type=jnp.float32)
        else:
            # f32: exact sequential f32 accumulation on VALU/XLU (broadcasts over lanes).
            o_ref[...] += jnp.sum(x, axis=1, keepdims=True)

    if v_rem == tile_v:
        # V tiles divide evenly (or padded-tiny case): no masking anywhere.
        accumulate(x_ref[...])
    else:
        @pl.when(j < n_v_tiles - 1)       # interior tiles: zero extra per-element work
        def _():
            accumulate(x_ref[...])

        @pl.when(j == n_v_tiles - 1)      # tail tile: select-mask OOB columns
        def _():
            col = jax.lax.broadcasted_iota(jnp.int32, (tile_n, tile_v), 1)
            x = x_ref[...]
            accumulate(jnp.where(col < v_rem, x, jnp.zeros_like(x)))


def label_smoothing_loss(x, target, *, size, padding_idx, smoothing,
                         block_n=None, block_v=None):
    """Pallas TPU LabelSmoothing.forward: KLDivLoss(reduction='batchmean')(x, true_dist)."""
    n, v = x.shape
    assert v == size, "x.shape[1] must equal `size`"
    confidence = 1.0 - smoothing
    fill = smoothing / (size - 2)

    # sum_j td_j*log(td_j) for one non-padding row (0*log0 dropped, matching KLDivLoss).
    # Compile-time Python constant — no in-kernel log, no materialized true_dist.
    const = 0.0
    if confidence > 0.0:
        const += confidence * math.log(confidence)
    if fill > 0.0:
        const += (size - 2) * fill * math.log(fill)

    target = target.astype(jnp.int32)

    # ---- O(N) glue terms, read straight from the ORIGINAL (unpadded) x ---------------
    x_t = jnp.take_along_axis(x, target[:, None], axis=1)[:, 0].astype(jnp.float32)
    x_p = x[:, padding_idx].astype(jnp.float32)
    nonpad = target != padding_idx

    # ---- kernel input: never copy/pad the big logits; only sub-minimum tiny dims -----
    g = {4: 8, 2: 16, 1: 32}[jnp.dtype(x.dtype).itemsize]   # sublane granularity
    x_k, n_eff, v_eff = x, n, v
    pad_r = g - n if n < g else 0
    pad_c = 128 - v if v < 128 else 0
    if pad_r or pad_c:            # only for tiny arrays; zero-fill is loss-neutral
        x_k = jnp.pad(x_k, ((0, pad_r), (0, pad_c)))
        n_eff, v_eff = n + pad_r, v + pad_c

    # Lane-dense V tiles (default 2048); cdiv grid + in-kernel masking handles tails.
    tile_v = block_v if block_v is not None else 2048
    tile_v = max(128, min((tile_v // 128) * 128, (v_eff // 128) * 128))
    if block_n is not None:
        tile_n = block_n
    else:
        tile_n = min(256, (n_eff // g) * g)
        # Prefer >= 2 row tiles so the "parallel" row axis can feed both v7x TensorCores.
        if n_eff >= 2 * g and -(-n_eff // tile_n) < 2:
            half = -(-n_eff // 2)
            tile_n = min((-(-half // g)) * g, (n_eff // g) * g)
    tile_n = max(g, min((tile_n // g) * g, (n_eff // g) * g))

    grid = (-(-n_eff // tile_n), -(-v_eff // tile_v))
    v_rem = v_eff - (grid[1] - 1) * tile_v       # valid columns in the last V tile

    kernel = functools.partial(
        _row_sum_kernel, tile_n=tile_n, tile_v=tile_v, n_v_tiles=grid[1],
        v_rem=v_rem, use_mxu=(x.dtype != jnp.float32))

    partials = pl.pallas_call(
        kernel,
        out_shape=jax.ShapeDtypeStruct((n_eff, 128), jnp.float32),
        grid_spec=pltpu.PrefetchScalarGridSpec(
            num_scalar_prefetch=0,
            grid=grid,
            in_specs=[pl.BlockSpec((tile_n, tile_v), lambda i, j: (i, j))],   # x streamed once
            out_specs=pl.BlockSpec((tile_n, 128), lambda i, j: (i, 0)),       # per-row-tile acc
        ),
        compiler_params=pltpu.CompilerParams(
            dimension_semantics=("parallel", "arbitrary"),
            vmem_limit_bytes=48 * 1024 * 1024,   # headroom for bigger tiles; < v7x 64 MiB VMEM
        ),
    )(x_k)

    row_sum = partials[:n, 0]                             # (N,) f32: S_i = sum_j x[i, j]
    per_row = (jnp.float32(-fill) * row_sum
               + jnp.float32(fill - confidence) * x_t
               + jnp.float32(fill) * x_p
               + jnp.float32(const))
    per_row = jnp.where(nonpad, per_row, jnp.float32(0.0))
    return jnp.sum(per_row) / jnp.float32(n)              # KLDivLoss 'batchmean'


def _reference_loss(x, target, *, size, padding_idx, smoothing):
    """Plain-JAX reference mirroring the PyTorch semantics, for verification."""
    x = x.astype(jnp.float32)
    n, v = x.shape
    confidence = 1.0 - smoothing
    col = jnp.arange(v)[None, :]
    tv = target[:, None]
    td = jnp.full((n, v), smoothing / (size - 2), jnp.float32)
    td = jnp.where(col == tv, confidence, td)
    td = td.at[:, padding_idx].set(0.0)
    td = jnp.where(tv == padding_idx, 0.0, td)
    kl = jnp.where(td > 0.0, td * (jnp.log(td) - x), 0.0)
    return jnp.sum(kl) / n


if __name__ == "__main__":
    padding_idx = 0
    smoothing = 0.1

    def check(x, t, size, smooth, rtol, atol, **kw):
        out = label_smoothing_loss(x, t, size=size, padding_idx=padding_idx,
                                   smoothing=smooth, **kw)
        out = jax.block_until_ready(out)
        ref = _reference_loss(x, t, size=size, padding_idx=padding_idx, smoothing=smooth)
        assert jnp.allclose(out, ref, rtol=rtol, atol=atol), (out, ref)

    key = jax.random.PRNGKey(0)
    kx, kt = jax.random.split(key)

    # 1) f32, aligned shapes, forced small tiles -> multi-step grid on both axes
    #    (exercises the parallel row axis and the V-axis accumulator).
    n1, v1 = 16, 512
    x1 = jax.nn.log_softmax(jax.random.normal(kx, (n1, v1), jnp.float32), axis=-1)
    t1 = jax.random.randint(kt, (n1,), 0, v1, dtype=jnp.int32).at[3].set(padding_idx)
    check(x1, t1, v1, smoothing, 3e-5, 3e-5, block_n=8, block_v=128)

    # 2) tiny unaligned shapes from the original PyTorch snippet (targets [1,2,0], 5 classes).
    x2 = jnp.log(jnp.array([[0.05, 0.1, 0.6, 0.2, 0.05]] * 3, jnp.float32))
    t2 = jnp.array([1, 2, 0], jnp.int32)
    check(x2, t2, 5, 0.4, 3e-5, 3e-5)

    # 3) bf16 activations streamed in native dtype -> MXU row-sum path.
    check(x1.astype(jnp.bfloat16), t1, v1, smoothing, 1e-4, 1e-4)

    # 4) f32, N and V not multiples of (8, 128) -> cdiv grid, masked tail V tile,
    #    discarded OOB rows of the tail row tile (no jnp.pad of the logits).
    n4, v4 = 13, 300
    kx4, kt4 = jax.random.split(jax.random.PRNGKey(1))
    x4 = jax.nn.log_softmax(jax.random.normal(kx4, (n4, v4), jnp.float32), axis=-1)
    t4 = jax.random.randint(kt4, (n4,), 0, v4, dtype=jnp.int32).at[0].set(padding_idx)
    check(x4, t4, v4, smoothing, 3e-5, 3e-5)

    # 5) bf16 unaligned -> masked MXU tail path.
    check(x4.astype(jnp.bfloat16), t4, v4, smoothing, 2e-4, 2e-4)

    print("KERNEL_OK")
</pallas_src>

<mosaic_0001>
module attributes {stable_mosaic.version = 11 : i64} {
  func.func @_row_sum_kernel(%arg0: i32, %arg1: i32, %arg2: memref<8x128xf32, #tpu.memory_space<vmem>>, %arg3: memref<8x128xf32, #tpu.memory_space<vmem>>) attributes {dimension_semantics = [#tpu.dimension_semantics<parallel>, #tpu.dimension_semantics<arbitrary>], iteration_bounds = array<i64: 2, 4>, scalar_prefetch = 0 : i64, scratch_operands = 0 : i64, tpu.core_type = #tpu.core_type<tc>, window_params = [{transform_indices = @transform_0, window_bounds = array<i64: 8, 128>}, {transform_indices = @transform_1, window_bounds = array<i64: 8, 128>}]} {
    %c0_i32 = arith.constant 0 : i32
    %0 = arith.cmpi eq, %arg1, %c0_i32 : i32
    %1 = arith.extui %0 : i1 to i32
    %c0_i32_0 = arith.constant 0 : i32
    %2 = arith.cmpi ne, %1, %c0_i32_0 : i32
    scf.if %2 {
      %cst_6 = arith.constant 0.000000e+00 : f32
      %10 = vector.broadcast %cst_6 : f32 to vector<8x128xf32>
      %c0_7 = arith.constant 0 : index
      %c0_8 = arith.constant 0 : index
      %11 = vector.load %arg3[%c0_7, %c0_8] : memref<8x128xf32, #tpu.memory_space<vmem>>, vector<8x128xf32>
      tpu.vector_store %arg3[%c0_7, %c0_8], %10 {strides = array<i32>} : memref<8x128xf32, #tpu.memory_space<vmem>>, vector<8x128xf32>,
    } else {
    }
    %c0 = arith.constant 0 : index
    %c0_1 = arith.constant 0 : index
    %3 = vector.load %arg2[%c0, %c0_1] : memref<8x128xf32, #tpu.memory_space<vmem>>, vector<8x128xf32>
    %c0_2 = arith.constant 0 : index
    %c0_3 = arith.constant 0 : index
    %4 = vector.load %arg3[%c0_2, %c0_3] : memref<8x128xf32, #tpu.memory_space<vmem>>, vector<8x128xf32>
    %cst = arith.constant dense<0.000000e+00> : vector<8xf32>
    %5 = vector.multi_reduction <add>, %3, %cst [1] : vector<8x128xf32> to vector<8xf32>
    %6 = vector.shape_cast %5 : vector<8xf32> to vector<8x1xf32>
    %7 = vector.broadcast %6 : vector<8x1xf32> to vector<8x128xf32>
    %8 = arith.addf %4, %7 : vector<8x128xf32>
    %c0_4 = arith.constant 0 : index
    %c0_5 = arith.constant 0 : index
    %9 = vector.load %arg3[%c0_4, %c0_5] : memref<8x128xf32, #tpu.memory_space<vmem>>, vector<8x128xf32>
    tpu.vector_store %arg3[%c0_4, %c0_5], %8 {strides = array<i32>} : memref<8x128xf32, #tpu.memory_space<vmem>>, vector<8x128xf32>,
    return
  }
  func.func @transform_0(%arg0: i32, %arg1: i32) -> (i32, i32) {
    %c0_i32 = arith.constant 0 : i32
    return %arg0, %arg1 : i32, i32
  }
  func.func @transform_1(%arg0: i32, %arg1: i32) -> (i32, i32) {
    %c0_i32 = arith.constant 0 : i32
    %c0_i32_0 = arith.constant 0 : i32
    return %arg0, %c0_i32 : i32, i32
  }
}

</mosaic_0001>

<bundles_post_ra>
// kernel: tpu_custom_call.1
= control target key start
LH: loop header
LB: loop body
LE: loop exit
PB: predicated region body
PF: predicated region fallthrough
CT: control target
= control target key end

     0   :  { %6 = vsyncpa [#allocation3], 0  ;;  %s760_s0 = inlined_call_operand.hbm [shape: f32[16,512], index: 0, kind: input, shape index: {}]   ;;  %s761_s1 = inlined_call_operand.hbm [shape: f32[16,128], index: 1, kind: output, shape index: {}]  }
   0x1   :  { %8 = vsyncpa [#allocation3 + $0x1], 0 }
   0x2   :  { %9 = vsyncpa [#allocation4], 0 }
   0x3   :  { %11 = vsyncpa [#allocation4 + $0x1], 0  ;;  %s541_s6 = smov 0   ;;  %s543_s7 = smov 0  }
   0x4   :  { %s545_s8 = smov 0   ;;  %s547_s9 = smov 0  }
   0x5   :  { %s549_s10 = smov 0   ;;  %s551_s11 = smov 0  }
   0x6   :  { %s553_s12 = smov 0   ;;  %s555_s13 = smov 0  }
   0x7   :  { %s557_s14 = smov 0   ;;  %s559_s15 = smov 0  }
   0x8   :  { %s561_s16 = smov 0  }
   0x9 LB: > { %s256_s17 = sadd.s32 4294967295, %s526_s16   ;;  %s257_s18 = sadd.s32 4294967294, %s526_s16   ;;  %s526_s16 = sphi %s561_s16, %s17_s16   ;;  %s522_s15 = sphi %s559_s15, %s781_s15   ;;  %s518_s14 = sphi %s557_s14, %s780_s14   ;;  %s514_s13 = sphi %s555_s13, %s779_s13   ;;  %s510_s12 = sphi %s553_s12, %s778_s12   ;;  %s506_s11 = sphi %s551_s11, %s777_s11   ;;  %s502_s10 = sphi %s549_s10, %s776_s10   ;;  %s498_s9 = sphi %s547_s9, %s775_s9   ;;  %s494_s8 = sphi %s545_s8, %s774_s8   ;;  %s490_s7 = sphi %s543_s7, %s773_s7   ;;  %s486_s6 = sphi %s541_s6, %s772_s6  }
   0xa   : > { %s26_s19 = sadd.s32 1, %s518_s14  ;;  %s29_s20 = sadd.s32 1, %s522_s15 }
   0xb   : > { %p27_p0 = scmp.ge.s32.totalorder %s26_s19, 4  ;;  %s38_s21 = sadd.s32 1, %s506_s11 }
   0xc   : > { %p45_p1 = scmp.ne.s32.totalorder %s506_s11, %s502_s10  ;;  %p46_p2 = scmp.eq.s32.totalorder %s526_s16, 0 }
   0xd   : > { %s783_s19 = smov (%p27_p0, %s26_s19), 0  ;;  %s785_s20 = smov (!%p27_p0, %s29_s20), %s522_s15 }
   0xe   : > { %s34_s22 = ssub.s32 %s518_s14, %s783_s19  ;;  %p607_p3 = por %p46_p2, %p45_p1 }
   0xf   : > { %p31_p4 = scmp.ge.s32.totalorder %s785_s20, 2  ;;  %p51_p5 = scmp.ne.s32.totalorder %s502_s10, %s498_s9 }
  0x10   : > { %p52_p6 = scmp.eq.s32.totalorder %s256_s17, 0  ;;  %s64_s24 = sadd.s32 1, %s494_s8 }
  0x11   : > { %s787_s20 = smov (%p31_p4, %s785_s20), 0  ;;  %p74_p8 = scmp.ne.s32.totalorder %s494_s8, %s490_s7 }
  0x12   : > { %p615_p7 = por %p52_p6, %p51_p5  ;;  %s33_s26 = ssub.s32 %s522_s15, %s787_s20 }
  0x13   : > { %p75_p9 = scmp.eq.s32.totalorder %s256_s17, 7  ;;  %s35_s27 = sor.u32 %s34_s22, %s33_s26 }
  0x14   : > { %p62_p10 = scmp.eq.s32.totalorder %s33_s26, 0  ;;  %p36_p11 = scmp.eq.s32.totalorder %s35_s27, 0 }
  0x15   : > { %p623_p12 = por %p75_p9, %p74_p8  ;;  %p80_p13 = scmp.ne.s32.totalorder %s490_s7, %s486_s6 }
  0x16   : > { %s628_s29 = scalar_select %p62_p10, %s494_s8, %s64_s24  }
  0x17   : > { %s765_s28 = scalar_select %p623_p12, 1, 0 }
  0x18   : > { %s631_s30 = scalar_select %p36_p11, %s506_s11, %s38_s21  }
  0x19   : > { %p81_p0 = scmp.eq.s32.totalorder %s257_s18, 7  ;;  %p283_p1 = scmp.lt.s32.totalorder %s526_s16, 8 }
  0x1a   : > { %s101_s3 = sand.u32 1, %s506_s11   ;;  %s261_s5 = sshll.u32 %s522_s15, 2 }
  0x1b   : > { %p636_p2 = por %p81_p0, %p80_p13  ;;  %s260_s4 = sshll.u32 %s101_s3, 3 }
  0x1c   : > { %s110_s9 = sadd.s32 %s518_s14, %s261_s5  ;;  %s105_s17 = scalar_lea.vmem [#allocation2], %s260_s4 }
  0x1d   : > { %s766_s2 = scalar_select %p636_p2, 1, 0 }
  0x1e   : > { %s114_s22 = sshll.u32 %s105_s17, 4  ;;  %s262_s26 = sshll.u32 %s110_s9, 7  ;;  %s643_s22 = int_to_ptr.vmem [resolvable:$true] %s114_s22 }
  0x1f   : > { %s648_s27 = scalar_lea.hbm %s760_s0, %s262_s26  ;;  %p652_p4 = pnand %p283_p1, %p607_p3 }
  0x20   : > { %s102_s4 = scalar_lea.sflag [#allocation3], %s101_s3  ;;  %s374_s5 = scalar_lea.hbm %s648_s27, 128 }
  0x21   : > { %p375_p8 = scmp.ne.s32.totalorder %s648_s27, %s374_s5  ;;  %p376_p9 = pneg %p652_p4 }
  0x22   : > { %s379_s17 = scalar_lea.hbm %s760_s0, 1024  ;;  %p380_p3 = scmp.lt.u32.totalorder %s648_s27, %s760_s0 }
  0x23   : > { %p377_p10 = pnand %p376_p9, %p375_p8  ;;  %p381_p13 = scmp.lt.u32.totalorder %s379_s17, %s374_s5 }
  0x24   : > { %p383_p1 = scmp.lt.u32.totalorder %s374_s5, %s648_s27 }
  0x25   : > { %p378_p11 = pneg %p377_p10  ;;  %p382_p0 = por %p381_p13, %p380_p3 }
  0x27   : > { %p384_p5 = por %p383_p1, %p382_p0 }
  0x29   : > { %p385_p6 = pnand %p384_p5, %p378_p11 }
  0x2b   : > { %388 = shalt.err (!%p385_p6)
}
  0x2c   : > { %s389_s3 = scalar_lea.vmem %s643_s22, 128  ;;  %s528_s21 = smov [#allocation2]  }
  0x2d   : > { %p390_p8 = scmp.ne.s32.totalorder %s643_s22, %s389_s3  ;;  %s394_s23 = sshll.u32 %s528_s21, 4  ;;  %s395_s23 = int_to_ptr.vmem [resolvable:$false] %s394_s23 }
  0x2e   : > { %s396_s9 = scalar_lea.vmem %s395_s23, 256  ;;  %p397_p12 = scmp.lt.s32.totalorder %s643_s22, %s395_s23 }
  0x2f   : > { %p392_p10 = pnand %p390_p8, %p376_p9  ;;  %p398_p3 = scmp.lt.s32.totalorder %s396_s9, %s389_s3 }
  0x31   : > { %p393_p2 = pneg %p392_p10  ;;  %p399_p13 = por %p398_p3, %p397_p12 }
  0x33   : > { %p400_p0 = pnand %p399_p13, %p393_p2 }
  0x35   : > { %403 = shalt.err (!%p400_p0)
}
  0x36   : > { %278 = dma.hbm_to_vmem [thread:$0]  (!%p652_p4), %s648_s27, 128, %s643_s22, %s102_s4  }
  0x37   : > { %p768_p5 = scmp.lt.s32.totalorder %s526_s16, 9  ;;  %p769_p6 = scmp.ge.s32.totalorder %s526_s16, 1 }
  0x39   : > { %p120_p9 = pnand %p769_p6, %p768_p5 }
  0x3a   : > { %s125_s5 = sand.u32 (!%p120_p9), 1, %s502_s10  }
  0x3b   : > { %123 = sbr.rel (%p120_p9) target bundleno = 235 (0xeb), region = 24  ;;  %s264_s17 = sshll.u32 (!%p120_p9), %s125_s5, 3 }
  0x3c   : > { %s126_s26 = scalar_lea.sflag (!%p120_p9), [#allocation3], %s125_s5  ;;  %s129_s24 = scalar_lea.vmem (!%p120_p9), [#allocation2], %s264_s17 }
  0x42   : > { %477 = dma.done.wait (%p615_p7), %s126_s26, 128  }
  0x43   : > { %479 = vsyncadd (%p615_p7), %s126_s26, 4294967168  ;;  %s145_s18 = sand.u32 1, %s490_s7   ;;  %p266_p12 = scmp.ne.s32.totalorder %s510_s12, 0 }
  0x44   : > { %s265_s3 = sshll.u32 %s145_s18, 3  ;;  %v529_v0 = vmov (!%p266_p12), 0.0  }
  0x45   : > { %s147_s21 = scalar_lea.vmem [#allocation5], %s265_s3  ;;  %151 = sbr.rel (%p266_p12) target bundleno = 76 (0x4c), region = 32 }
  0x46   : > { %152 = vst [vmem:[%s147_s21] sm:$0xff] (!%p266_p12), %v529_v0 }
  0x4c PF: > { %v153_v1 = vld [vmem:[%s129_s24] sm:$0xff]  ;;  %s268_s22 = sshll.u32 %s514_s13, 7  ;;  %s173_s27 = sshll.u32 %s147_s21, 4  ;;  %s700_s27 = int_to_ptr.vmem [resolvable:$true] %s173_s27 }
  0x4d   : > { %155 = vadd.xlane.f32.xlu0 %v153_v1  ;;  %v154_v2 = vld [vmem:[%s147_s21] sm:$0xff]  ;;  %s698_s23 = scalar_lea.hbm %s761_s1, %s268_s22  ;;  %s160_s12 = scalar_lea.sflag [#allocation4], %s145_s18 }
  0x4e   : > { %s404_s9 = scalar_lea.vmem %s700_s27, 128  ;;  %p770_p2 = scmp.ne.s32.totalorder %s765_s28, 0 }
  0x4f   : > { %p405_p7 = scmp.ne.s32.totalorder %s700_s27, %s404_s9  ;;  %s530_s13 = smov [#allocation5]  }
  0x50   : > { %s408_s5 = sshll.u32 %s530_s13, 4  ;;  %s409_s5 = int_to_ptr.vmem [resolvable:$false] %s408_s5 }
  0x51   : > { %p406_p4 = pnand %p405_p7, %p770_p2  ;;  %s410_s17 = scalar_lea.vmem %s409_s5, 256 }
  0x52   : > { %p411_p1 = scmp.lt.s32.totalorder %s700_s27, %s409_s5  ;;  %p412_p8 = scmp.lt.s32.totalorder %s410_s17, %s404_s9 }
  0x53   : > { %p407_p11 = pneg %p406_p4 }
  0x54   : > { %p413_p10 = por %p412_p8, %p411_p1 }
  0x56   : > { %p414_p3 = pnand %p413_p10, %p407_p11 }
  0xda   : > { %v156_v3 = vpop.xlane.xlu0 %155 }
  0xdb   : > { %v157_v4 = vadd.f32 %v156_v3, %v154_v2 }
  0xdd   : > { %158 = vst [vmem:[%s147_s21] sm:$0xff] %v157_v4 }
  0xde   : > { %417 = shalt.err (!%p414_p3)
}
  0xdf   : > { %s418_s26 = scalar_lea.hbm %s698_s23, 128  ;;  %s422_s3 = scalar_lea.hbm %s761_s1, 256 }
  0xe0   : > { %p419_p13 = scmp.ne.s32.totalorder %s698_s23, %s418_s26  ;;  %p423_p6 = scmp.lt.u32.totalorder %s698_s23, %s761_s1 }
  0xe1   : > { %p424_p9 = scmp.lt.u32.totalorder %s422_s3, %s418_s26  ;;  %p426_p7 = scmp.lt.u32.totalorder %s418_s26, %s698_s23 }
  0xe2   : > { %p420_p0 = pnand %p419_p13, %p770_p2 }
  0xe3   : > { %p425_p12 = por %p424_p9, %p423_p6 }
  0xe4   : > { %p421_p5 = pneg %p420_p0 }
  0xe5   : > { %p427_p4 = por %p426_p7, %p425_p12 }
  0xe7   : > { %p428_p11 = pnand %p427_p4, %p421_p5 }
  0xe9   : > { %431 = shalt.err (!%p428_p11)
}
  0xea   : > { %273 = dma.vmem_to_hbm [thread:$0]  (%p770_p2), %s700_s27, 128, %s698_s23, %s160_s12  }
  0xeb PF: > { %p284_p1 = scmp.ge.s32.totalorder %s526_s16, 2  ;;  %s185_s25 = sand.u32 1, %s486_s6  }
  0xec   : > { %p771_p8 = scmp.ne.s32.totalorder %s766_s2, 0  ;;  %s186_s4 = scalar_lea.sflag [#allocation4], %s185_s25 }
  0xee   : > { %p280_p10 = pnand %p284_p1, %p771_p8 }
  0xf0   : > { %481 = dma.done.wait (!%p280_p10), %s186_s4, 128  }
  0xf1   : > { %483 = vsyncadd (!%p280_p10), %s186_s4, 4294967168  ;;  %s17_s16 = sadd.s32 1, %s526_s16   ;;  %s772_s6 = smov %s490_s7 }
  0xf2   : > { %p14_p3 = scmp.ge.s32.totalorder %s17_s16, 10   ;;  %s773_s7 = smov %s494_s8 }
  0xf3   : > { %s774_s8 = smov %s628_s29  ;;  %s775_s9 = smov %s502_s10 }
  0xf4   : > { %s776_s10 = smov %s506_s11  ;;  %s777_s11 = smov %s631_s30 }
  0xf5   : > { %s778_s12 = smov %s518_s14  ;;  %s779_s13 = smov %s522_s15 }
  0xf6   : > { %s780_s14 = smov %s783_s19  ;;  %s781_s15 = smov %s787_s20 }
  0xf7   :  { %16 = sbr.rel (!%p14_p3) target bundleno = 9 (0x9), region = 73 }
  0xfe   :  { %191 = vsyncpa [#allocation3], 1 }
  0xff   :  { %193 = vsyncpa [#allocation3 + $0x1], 1 }
 0x100   :  { %194 = vsyncpa [#allocation4], 1 }
 0x101   :  { %196 = vsyncpa [#allocation4 + $0x1], 1 }

</bundles_post_ra>
